<compile_context>
chip_gen: v6e
topology: v6e:2x2x1
jax: 0.10.0
libtpu: 0.0.40
codegen_flags: <defaults>
</compile_context>

<pallas_src>
import functools
import os

import jax
import jax.numpy as jnp
from jax.experimental import pallas as pl
from jax.experimental.pallas import tpu as pltpu


def glcn_kernel(h_i_ref, h_j_ref, a_ref, g_ref, gdiag_ref, s_ref, *, inv_tau):
    """One grid step handles an (i-row-block, j-col-block) tile of node pairs.

    Accumulates sum of log(1 - sigmoid((logits + gumbel)/tau) + 1e-8) over the
    off-diagonal pairs of this i-block into the i-block's SMEM partial.
    """
    j = pl.program_id(1)

    h_i = h_i_ref[...]          # (bm, F)  rows of this i block
    h_j = h_j_ref[...]          # (bn, F)  rows of this j block
    a_row = a_ref[...]          # (1,  F)  a_link as a lane-aligned row

    bm, F = h_i.shape

    # Pairwise |h_i[r] - h_j[c]| weighted by a, reduced over F.
    # VPU sub/abs/mul on the (bm, bn, F) tile; XLU lane-reduce over F (separate
    # VLIW slot from the VPU work, so it overlaps).
    diff = jnp.abs(h_i[:, None, :] - h_j[None, :, :])                 # (bm, bn, F)
    logits = jnp.sum(diff * a_row.reshape(1, 1, F), axis=-1)          # (bm, bn)

    z = logits + g_ref[...]                                           # (bm, bn)
    if inv_tau != 1.0:            # static python float -> multiply elided at tau == 1
        z = z * inv_tau

    # gumbel_sigmoid(hard=True): forward value of the hard sample is 0, so
    # selected = 1 - y_soft.  Keep the reference's +1e-8 clip behaviour exactly
    # (no -softplus fusion, which would change the clip for saturated sigmoids).
    logp = jnp.log((1.0 - jax.nn.sigmoid(z)) + 1e-8)                  # (bm, bn)

    @pl.when(j == 0)
    def _init():
        # Diagonal pairs have logits exactly 0 (|h_r - h_r| == 0), so their excluded
        # contribution depends only on diag(gumbel); initialize this i-block's partial
        # with minus that correction, once per i-block.
        zd = gdiag_ref[...]                                           # (bm, 1)
        if inv_tau != 1.0:
            zd = zd * inv_tau
        s_ref[0, 0] = -jnp.sum(jnp.log((1.0 - jax.nn.sigmoid(zd)) + 1e-8))

    s_ref[0, 0] += jnp.sum(logp)


def _pick_block(n, target, align):
    """Largest divisor of n that is <= target and a multiple of `align`; else n.

    Returning n (the full dim) also satisfies the TPU (8, 128) block constraint.
    """
    cap = min(n, target)
    for d in range(cap, 0, -1):
        if n % d == 0 and d % align == 0:
            return d
    return n


def glcn_forward(h, a_link, gumbel, *, tau=1.0, bm_target=128, bn_target=256,
                 vmem_limit_bytes=48 * 1024 * 1024):
    """h: (N, feature_size); a_link: (feature_obs_size, 1); gumbel: (N, N) Gumbel(0,1).

    Defaults are sized for v7x's 64 MiB per-TC VMEM; on v5e/v6e (128 MiB) raise
    vmem_limit_bytes toward ~100 MiB and bn_target toward 1024 for bigger tiles.
    """
    N = h.shape[0]
    F = a_link.shape[0]                        # feature_obs_size

    # Host-side prep (cheap, keeps BlockSpec last-dims equal to full array dims).
    h_obs = h[:, :F].astype(jnp.float32)
    a_row = a_link.reshape(1, F).astype(jnp.float32)          # lane-aligned broadcast row
    g = gumbel.astype(jnp.float32)
    g_diag = jnp.diagonal(gumbel).reshape(N, 1).astype(jnp.float32)

    bm = _pick_block(N, bm_target, 8)          # row-block: multiple of 8 (sublane) or N
    bn = _pick_block(N, bn_target, 128)        # col-block: multiple of 128 (lane) or N
    num_i = N // bm
    num_j = N // bn

    partials = pl.pallas_call(
        functools.partial(glcn_kernel, inv_tau=1.0 / float(tau)),
        grid=(num_i, num_j),
        in_specs=[
            pl.BlockSpec((bm, F), lambda i, j: (i, 0)),     # i-row block of h
            pl.BlockSpec((bn, F), lambda i, j: (j, 0)),     # j-row block of h
            pl.BlockSpec((1, F), lambda i, j: (0, 0)),      # a_link row (tiny, invariant)
            pl.BlockSpec((bm, bn), lambda i, j: (i, j)),    # gumbel tile (lane-dense)
            pl.BlockSpec((bm, 1), lambda i, j: (i, 0)),     # diag(gumbel) for i-rows
        ],
        # One SMEM partial per i-row-block; accumulation happens only along the
        # "arbitrary" j axis, so the i axis can be "parallel" (v7x megacore) race-free.
        out_specs=pl.BlockSpec(
            (1, 1), lambda i, j: (i, 0), memory_space=pltpu.MemorySpace.SMEM
        ),
        out_shape=jax.ShapeDtypeStruct((num_i, 1), jnp.float32),
        compiler_params=pltpu.CompilerParams(
            dimension_semantics=("parallel", "arbitrary"),
            vmem_limit_bytes=vmem_limit_bytes,
        ),
    )(h_obs, h_obs, a_row, g, g_diag)

    summed_values = jnp.sum(partials).reshape(1)             # shape (batch=1,)

    # The hard gumbel sample is all-zeros, so A = (A - diag(A)) + I is exactly I.
    A = jnp.eye(N, dtype=jnp.float32)
    return A, summed_values


if __name__ == "__main__":
    key = jax.random.PRNGKey(0)
    k_h, k_a, k_g = jax.random.split(key, 3)

    # Module hyper-params (graph_embedding_size is unused by forward).
    feature_size = 48
    graph_embedding_size = 16
    feature_obs_size = 32
    num_nodes = 8

    h = jax.random.normal(k_h, (num_nodes, feature_size), dtype=jnp.float32)

    # a_link: xavier_uniform_(gain=1.414) on shape (feature_obs_size, 1)
    gain = 1.414
    bound = gain * (6.0 / (feature_obs_size + 1)) ** 0.5
    a_link = jax.random.uniform(
        k_a, (feature_obs_size, 1), minval=-bound, maxval=bound, dtype=jnp.float32
    )

    # Gumbel(0,1) noise, same construction as torch: -log(Exponential(1) sample)
    gumbel = -jnp.log(
        jax.random.exponential(k_g, (num_nodes, num_nodes), dtype=jnp.float32)
    )

    tau = float(os.environ.get("gumbel_tau", 1.0))

    A, summed_values = glcn_forward(h, a_link, gumbel, tau=tau)
    jax.block_until_ready((A, summed_values))

    # Pure-JAX reference of the same forward math.
    h_obs = h[:, :feature_obs_size]
    logits_ref = jnp.sum(
        jnp.abs(h_obs[:, None, :] - h_obs[None, :, :]) * a_link[:, 0][None, None, :],
        axis=-1,
    )
    y_soft = jax.nn.sigmoid((logits_ref + gumbel) / tau)
    eye = jnp.eye(num_nodes, dtype=bool)
    s_ref = jnp.sum(jnp.where(eye, 0.0, jnp.log((1.0 - y_soft) + 1e-8)))
    A_ref = jnp.eye(num_nodes, dtype=jnp.float32)

    assert A.shape == (num_nodes, num_nodes)
    assert summed_values.shape == (1,)
    assert bool(jnp.allclose(A, A_ref))
    # Loose tolerance: in-kernel summation order (tile-sum minus exact diagonal
    # correction) differs from the masked elementwise reference.
    assert bool(jnp.allclose(summed_values[0], s_ref, rtol=2e-2, atol=1e-2))
    print("KERNEL_OK")
</pallas_src>

<mosaic_0001>
module attributes {stable_mosaic.version = 11 : i64} {
  func.func @glcn_kernel(%arg0: i32, %arg1: i32, %arg2: memref<8x32xf32, #tpu.memory_space<vmem>>, %arg3: memref<8x32xf32, #tpu.memory_space<vmem>>, %arg4: memref<1x32xf32, #tpu.memory_space<vmem>>, %arg5: memref<8x8xf32, #tpu.memory_space<vmem>>, %arg6: memref<8x1xf32, #tpu.memory_space<vmem>>, %arg7: memref<1x1xf32, #tpu.memory_space<smem>>) attributes {dimension_semantics = [#tpu.dimension_semantics<parallel>, #tpu.dimension_semantics<arbitrary>], iteration_bounds = array<i64: 1, 1>, scalar_prefetch = 0 : i64, scratch_operands = 0 : i64, tpu.core_type = #tpu.core_type<tc>, window_params = [{transform_indices = @transform_0, window_bounds = array<i64: 8, 32>}, {transform_indices = @transform_1, window_bounds = array<i64: 8, 32>}, {pipeline_mode = #tpu.pipeline_mode<synchronous>, transform_indices = @transform_2, window_bounds = array<i64: 1, 32>}, {transform_indices = @transform_3, window_bounds = array<i64: 8, 8>}, {transform_indices = @transform_4, window_bounds = array<i64: 8, 1>}, {transform_indices = @transform_5, window_bounds = array<i64: 1, 1>}]} {
    %c0 = arith.constant 0 : index
    %c0_0 = arith.constant 0 : index
    %0 = vector.load %arg2[%c0, %c0_0] : memref<8x32xf32, #tpu.memory_space<vmem>>, vector<8x32xf32>
    %c0_1 = arith.constant 0 : index
    %c0_2 = arith.constant 0 : index
    %1 = vector.load %arg3[%c0_1, %c0_2] : memref<8x32xf32, #tpu.memory_space<vmem>>, vector<8x32xf32>
    %c0_3 = arith.constant 0 : index
    %c0_4 = arith.constant 0 : index
    %2 = vector.load %arg4[%c0_3, %c0_4] : memref<1x32xf32, #tpu.memory_space<vmem>>, vector<1x32xf32>
    %3 = vector.shape_cast %0 : vector<8x32xf32> to vector<8x1x32xf32>
    %4 = vector.shape_cast %1 : vector<8x32xf32> to vector<1x8x32xf32>
    %5 = vector.broadcast %3 : vector<8x1x32xf32> to vector<8x8x32xf32>
    %6 = vector.broadcast %4 : vector<1x8x32xf32> to vector<8x8x32xf32>
    %7 = arith.subf %5, %6 : vector<8x8x32xf32>
    %8 = math.absf %7 : vector<8x8x32xf32>
    %9 = vector.shape_cast %2 : vector<1x32xf32> to vector<1x1x32xf32>
    %10 = vector.broadcast %9 : vector<1x1x32xf32> to vector<8x8x32xf32>
    %11 = arith.mulf %8, %10 : vector<8x8x32xf32>
    %cst = arith.constant dense<0.000000e+00> : vector<8x8xf32>
    %12 = vector.multi_reduction <add>, %11, %cst [2] : vector<8x8x32xf32> to vector<8x8xf32>
    %c0_5 = arith.constant 0 : index
    %c0_6 = arith.constant 0 : index
    %13 = vector.load %arg5[%c0_5, %c0_6] : memref<8x8xf32, #tpu.memory_space<vmem>>, vector<8x8xf32>
    %14 = arith.addf %12, %13 : vector<8x8xf32>
    %15 = arith.negf %14 : vector<8x8xf32>
    %16 = math.exp %15 : vector<8x8xf32>
    %cst_7 = arith.constant 1.000000e+00 : f32
    %17 = vector.broadcast %cst_7 : f32 to vector<8x8xf32>
    %18 = arith.addf %17, %16 : vector<8x8xf32>
    %19 = arith.divf %17, %18 : vector<8x8xf32>
    %cst_8 = arith.constant 1.000000e+00 : f32
    %20 = vector.broadcast %cst_8 : f32 to vector<8x8xf32>
    %21 = arith.subf %20, %19 : vector<8x8xf32>
    %cst_9 = arith.constant 9.99999993E-9 : f32
    %22 = vector.broadcast %cst_9 : f32 to vector<8x8xf32>
    %23 = arith.addf %21, %22 : vector<8x8xf32>
    %24 = math.log %23 : vector<8x8xf32>
    %c0_i32 = arith.constant 0 : i32
    %25 = arith.cmpi eq, %arg1, %c0_i32 : i32
    %26 = arith.extui %25 : i1 to i32
    %c0_i32_10 = arith.constant 0 : i32
    %27 = arith.cmpi ne, %26, %c0_i32_10 : i32
    scf.if %27 {
      %c0_16 = arith.constant 0 : index
      %c0_17 = arith.constant 0 : index
      %35 = vector.load %arg6[%c0_16, %c0_17] : memref<8x1xf32, #tpu.memory_space<vmem>>, vector<8x1xf32>
      %36 = arith.negf %35 : vector<8x1xf32>
      %37 = math.exp %36 : vector<8x1xf32>
      %cst_18 = arith.constant 1.000000e+00 : f32
      %38 = vector.broadcast %cst_18 : f32 to vector<8x1xf32>
      %39 = arith.addf %38, %37 : vector<8x1xf32>
      %40 = arith.divf %38, %39 : vector<8x1xf32>
      %cst_19 = arith.constant 1.000000e+00 : f32
      %41 = vector.broadcast %cst_19 : f32 to vector<8x1xf32>
      %42 = arith.subf %41, %40 : vector<8x1xf32>
      %cst_20 = arith.constant 9.99999993E-9 : f32
      %43 = vector.broadcast %cst_20 : f32 to vector<8x1xf32>
      %44 = arith.addf %42, %43 : vector<8x1xf32>
      %45 = math.log %44 : vector<8x1xf32>
      %46 = vector.shape_cast %45 : vector<8x1xf32> to vector<1x8x1xf32>
      %cst_21 = arith.constant dense<0.000000e+00> : vector<1xf32>
      %47 = vector.multi_reduction <add>, %46, %cst_21 [1, 2] : vector<1x8x1xf32> to vector<1xf32>
      %48 = vector.shape_cast %47 : vector<1xf32> to vector<1x1x1xf32>
      %49 = vector.extract %48[0, 0, 0] : f32 from vector<1x1x1xf32>
      %cst_22 = arith.constant 0.000000e+00 : f32
      %50 = arith.subf %cst_22, %49 : f32
      %c0_23 = arith.constant 0 : index
      %c0_24 = arith.constant 0 : index
      %51 = memref.load %arg7[%c0_23, %c0_24] : memref<1x1xf32, #tpu.memory_space<smem>>
      memref.store %50, %arg7[%c0_23, %c0_24] : memref<1x1xf32, #tpu.memory_space<smem>>
    } else {
    }
    %c0_11 = arith.constant 0 : index
    %c0_12 = arith.constant 0 : index
    %28 = memref.load %arg7[%c0_11, %c0_12] : memref<1x1xf32, #tpu.memory_space<smem>>
    %29 = vector.shape_cast %24 : vector<8x8xf32> to vector<1x8x8xf32>
    %cst_13 = arith.constant dense<0.000000e+00> : vector<1xf32>
    %30 = vector.multi_reduction <add>, %29, %cst_13 [1, 2] : vector<1x8x8xf32> to vector<1xf32>
    %31 = vector.shape_cast %30 : vector<1xf32> to vector<1x1x1xf32>
    %32 = vector.extract %31[0, 0, 0] : f32 from vector<1x1x1xf32>
    %33 = arith.addf %28, %32 : f32
    %c0_14 = arith.constant 0 : index
    %c0_15 = arith.constant 0 : index
    %34 = memref.load %arg7[%c0_14, %c0_15] : memref<1x1xf32, #tpu.memory_space<smem>>
    memref.store %33, %arg7[%c0_14, %c0_15] : memref<1x1xf32, #tpu.memory_space<smem>>
    return
  }
  func.func @transform_0(%arg0: i32, %arg1: i32) -> (i32, i32) {
    %c0_i32 = arith.constant 0 : i32
    %c0_i32_0 = arith.constant 0 : i32
    return %arg0, %c0_i32 : i32, i32
  }
  func.func @transform_1(%arg0: i32, %arg1: i32) -> (i32, i32) {
    %c0_i32 = arith.constant 0 : i32
    %c0_i32_0 = arith.constant 0 : i32
    return %arg1, %c0_i32 : i32, i32
  }
  func.func @transform_2(%arg0: i32, %arg1: i32) -> (i32, i32) {
    %c0_i32 = arith.constant 0 : i32
    %c0_i32_0 = arith.constant 0 : i32
    %c0_i32_1 = arith.constant 0 : i32
    return %c0_i32, %c0_i32_0 : i32, i32
  }
  func.func @transform_3(%arg0: i32, %arg1: i32) -> (i32, i32) {
    %c0_i32 = arith.constant 0 : i32
    return %arg0, %arg1 : i32, i32
  }
  func.func @transform_4(%arg0: i32, %arg1: i32) -> (i32, i32) {
    %c0_i32 = arith.constant 0 : i32
    %c0_i32_0 = arith.constant 0 : i32
    return %arg0, %c0_i32 : i32, i32
  }
  func.func @transform_5(%arg0: i32, %arg1: i32) -> (i32, i32) {
    %c0_i32 = arith.constant 0 : i32
    %c0_i32_0 = arith.constant 0 : i32
    return %arg0, %c0_i32 : i32, i32
  }
}

</mosaic_0001>

<bundles_post_ra>
// kernel: tpu_custom_call.1
= control target key start
LH: loop header
LB: loop body
LE: loop exit
PB: predicated region body
PF: predicated region fallthrough
CT: control target
= control target key end

     0   :  { %10 = vsyncpa [#allocation3], 0  ;;  %s703_s0 = inlined_call_operand.vmem [shape: f32[8,32], index: 0, kind: input, shape index: {}]   ;;  %s704_s1 = inlined_call_operand.hbm [shape: f32[8,32], index: 1, kind: input, shape index: {}]   ;;  %s705_s2 = inlined_call_operand.vmem [shape: f32[1,32], index: 2, kind: input, shape index: {}]   ;;  %s706_s3 = inlined_call_operand.hbm [shape: f32[8,8], index: 3, kind: input, shape index: {}]   ;;  %s707_s4 = inlined_call_operand.vmem [shape: f32[8,1], index: 4, kind: input, shape index: {}]   ;;  %s708_s5 = inlined_call_operand.hbm [shape: f32[1,1], index: 5, kind: output, shape index: {}]  }
   0x1   :  { %11 = vsyncpa [#allocation6], 0 }
   0x2   :  { %12 = vsyncpa [#allocation4], 0  ;;  %s617_s18 = smov [#allocation2]   ;;  %s618_s20 = smov [#allocation5]  }
   0x3   :  { %s21_s19 = sshll.u32 %s617_s18, 4  ;;  %s33_s21 = sshll.u32 %s618_s20, 4  ;;  %s22_s19 = int_to_ptr.vmem [resolvable:$true] %s21_s19  ;;  %s34_s21 = int_to_ptr.vmem [resolvable:$true] %s33_s21 }
   0x4   :  { %s571_s22 = scalar_lea.vmem %s22_s19, 128  ;;  %p576_p1 = scmp.lt.s32.totalorder %s22_s19, %s22_s19 }
   0x5   :  { %p572_p0 = scmp.ne.s32.totalorder %s22_s19, %s571_s22  ;;  %p577_p2 = scmp.lt.s32.totalorder %s571_s22, %s571_s22 }
   0x7   :  { %p578_p3 = por %p577_p2, %p576_p1 }
   0x9   :  { %p579_p4 = pnand %p578_p3, %p572_p0 }
   0xb   :  { %582 = shalt.err (!%p579_p4)
}
   0xc   :  { %24 = dma.hbm_to_vmem [thread:$0]  %s704_s1, 128, %s22_s19, [#allocation3]  }
   0xd   :  { %s591_s25 = scalar_lea.vmem %s34_s21, 128  ;;  %p596_p6 = scmp.lt.s32.totalorder %s34_s21, %s34_s21 }
   0xe   :  { %p592_p5 = scmp.ne.s32.totalorder %s34_s21, %s591_s25  ;;  %p597_p7 = scmp.lt.s32.totalorder %s591_s25, %s591_s25 }
  0x10   :  { %p598_p8 = por %p597_p7, %p596_p6 }
  0x12   :  { %p599_p9 = pnand %p598_p8, %p592_p5 }
  0x14   :  { %602 = shalt.err (!%p599_p9)
}
  0x15   :  { %36 = dma.hbm_to_vmem [thread:$0]  %s706_s3, 128, %s34_s21, [#allocation6]  }
  0x16   :  { %611 = dma.done.wait [#allocation3], 128  }
  0x17   :  { %612 = vsyncadd [#allocation3], 4294967168 }
  0x18   :  { %613 = dma.done.wait [#allocation6], 128  }
  0x19   :  { %614 = vsyncadd [#allocation6], 4294967168  ;;  %v53_v0 = vlaneseq  ;;  %v619_v1 = vmov 1966171168   ;;  %v45_v6 = vld [vmem:[%s703_s0] sm:$0xff]  ;;  %vm168_vm0 = vcmask 261120  }
  0x1a   :  { %v51_v2 = vunpack.c.l.s4 %v619_v1  ;;  %v49_v9 = vcombine.high %v45_v6, %v45_v6  ;;  %v46_v13 = vld [vmem:[#allocation2] sm:$0xff]  ;;  %v193_v1 = vld [vmem:[#allocation5] sm:$0xff]  ;;  %vm362_vm1 = vcmask 7168   ;;  %vm443_vm2 = vcmask 1041409   ;;  %s621_s8 = smov [#allocation7]  }
  0x1b   :  { %v659_v3 = vshrl.u32 %v53_v0, 7  ;;  %v487_v23 = vld [vmem:[%s705_s2] ss:$0 sm:$0xff]  ;;  %vm445_vm3 = vcmask 1042434   ;;  %vm447_vm4 = vcmask 1043459   ;;  %vm449_vm5 = vcmask 1044484  }
  0x1c   :  { %v52_v4 = vunpack.c.0.s8 %v51_v2  ;;  %vm451_vm6 = vcmask 1045509   ;;  %vm453_vm7 = vcmask 1046534   ;;  %vm455_vm8 = vcmask 1047559  }
  0x1d   :  { %v666_v8 = vsub.s32 0, %v659_v3  ;;  %v204_v63 = vsub.s32 1, %v659_v3  ;;  %vm458_vm9 = vcmask 64512  }
  0x1e   :  { %v55_v5 = vsub.s32 %v52_v4, %v659_v3  ;;  %v211_v4 = vsub.s32 2, %v659_v3 }
  0x1f   :  { %v205_v2 = vrot.slane %v193_v1, %v204_v63 }
  0x20   :  { %v56_v7 = vrot.slane %v45_v6, %v55_v5  ;;  %v63_v12 = vrot.slane %v49_v9, %v55_v5  ;;  %v225_v6 = vsub.s32 4, %v659_v3  ;;  %v218_v9 = vsub.s32 3, %v659_v3 }
  0x22   :  { %v72_v10 = vrot.slane %v56_v7, %v55_v5  ;;  %v64_v11 = vcombine.high %v56_v7, %v56_v7  ;;  %v79_v17 = vrot.slane %v63_v12, %v55_v5  ;;  %v65_v18 = vcombine.high %v63_v12, %v63_v12 }
  0x23   :  { %v212_v7 = vrot.slane %v193_v1, %v211_v4  ;;  %v219_v12 = vrot.slane %v193_v1, %v218_v9 }
  0x24   :  { %v101_v14 = vrot.slane %v72_v10, %v666_v8  ;;  %v94_v15 = vcombine.high %v72_v10, %v72_v10  ;;  %v86_v16 = vrot.slane %v64_v11, %v55_v5  ;;  %v117_v24 = vrot.slane %v79_v17, %v666_v8 }
  0x25   :  { %v93_v25 = vrot.slane %v65_v18, %v55_v5  ;;  %v95_v26 = vcombine.high %v79_v17, %v79_v17  ;;  %v198_v5 = vrot.slane %v193_v1, %v666_v8  ;;  %v226_v10 = vrot.slane %v193_v1, %v225_v6 }
  0x26   :  { %v138_v19 = vsub.f32 %v101_v14, %v46_v13  ;;  %v109_v20 = vrot.slane %v94_v15, %v666_v8  ;;  %v105_v21 = vrot.slane %v86_v16, %v666_v8  ;;  %v96_v22 = vcombine.high %v86_v16, %v86_v16 }
  0x27   :  { %v142_v31 = vsub.f32 %v117_v24, %v46_v13  ;;  %v121_v32 = vrot.slane %v93_v25, %v666_v8  ;;  %v125_v33 = vrot.slane %v95_v26, %v666_v8  ;;  %v97_v34 = vcombine.high %v93_v25, %v93_v25 }
  0x28   :  { %v146_v27 = vand.u32 2147483647, %v138_v19  ;;  %v140_v28 = vsub.f32 %v109_v20, %v46_v13  ;;  %v139_v29 = vsub.f32 %v105_v21, %v46_v13  ;;  %v113_v30 = vrot.slane %v96_v22, %v666_v8 }
  0x29   :  { %v150_v39 = vand.u32 2147483647, %v142_v31  ;;  %v143_v40 = vsub.f32 %v121_v32, %v46_v13  ;;  %v144_v41 = vsub.f32 %v125_v33, %v46_v13  ;;  %v129_v42 = vrot.slane %v97_v34, %v666_v8 }
  0x2a   :  { %v160_v35 = vmul.f32 %v487_v23, %v146_v27  ;;  %v148_v36 = vand.u32 2147483647, %v140_v28  ;;  %v147_v37 = vand.u32 2147483647, %v139_v29  ;;  %v141_v38 = vsub.f32 %v113_v30, %v46_v13 }
  0x2b   :  { %v164_v47 = vmul.f32 %v487_v23, %v150_v39  ;;  %v151_v48 = vand.u32 2147483647, %v143_v40  ;;  %v145_v49 = vsub.f32 %v129_v42, %v46_v13  ;;  %v152_v53 = vand.u32 2147483647, %v144_v41 }
  0x2c   :  { %v169_v43 = vsel %vm168_vm0, %v160_v35, 0.0  ;;  %v162_v44 = vmul.f32 %v487_v23, %v148_v36  ;;  %v161_v45 = vmul.f32 %v487_v23, %v147_v37  ;;  %v149_v46 = vand.u32 2147483647, %v141_v38 }
  0x2d   :  { %170 = vadd.xlane.f32.xlu0 %v169_v43  ;;  %v165_v55 = vmul.f32 %v487_v23, %v151_v48  ;;  %v153_v56 = vand.u32 2147483647, %v145_v49  ;;  %v181_v57 = vsel %vm168_vm0, %v164_v47, 0.0  ;;  %v166_v58 = vmul.f32 %v487_v23, %v152_v53 }
  0x2e   :  { %v175_v50 = vsel %vm168_vm0, %v162_v44, 0.0  ;;  %v172_v51 = vsel %vm168_vm0, %v161_v45, 0.0  ;;  %v163_v52 = vmul.f32 %v487_v23, %v149_v46  ;;  %v239_v11 = vsub.s32 6, %v659_v3 }
  0x2f   :  { %176 = vadd.xlane.f32.xlu1 %v175_v50  ;;  %v184_v59 = vsel %vm168_vm0, %v165_v55, 0.0  ;;  %v167_v60 = vmul.f32 %v487_v23, %v153_v56  ;;  %v187_v61 = vsel %vm168_vm0, %v166_v58, 0.0  ;;  %v232_v13 = vsub.s32 5, %v659_v3 }
  0x30   :  { %v178_v54 = vsel %vm168_vm0, %v163_v52, 0.0  ;;  %v240_v14 = vrot.slane %v193_v1, %v239_v11  ;;  %v246_v8 = vsub.s32 7, %v659_v3  ;;  %v620_v17 = vmov 0  }
  0x31   :  { %173 = vadd.xlane.f32.xlu0 %v172_v51  ;;  %v190_v62 = vsel %vm168_vm0, %v167_v60, 0.0  ;;  %v233_v15 = vrot.slane %v193_v1, %v232_v13  ;;  %507 = vset.pattern.permute.xlu1 %v620_v17 }
  0x32   :  { %v247_v16 = vrot.slane %v193_v1, %v246_v8  ;;  %506 = vset.pattern.permute.xlu0 %v620_v17 }
  0x33   :  { %179 = vadd.xlane.f32.xlu1 %v178_v54 }
  0x35   :  { %182 = vadd.xlane.f32.xlu0 %v181_v57 }
  0x37   :  { %185 = vadd.xlane.f32.xlu1 %v184_v59 }
  0x39   :  { %188 = vadd.xlane.f32.xlu0 %v187_v61 }
  0x3b   :  { %191 = vadd.xlane.f32.xlu1 %v190_v62  ;;  %v351_v62 = vld [vmem:[%s707_s4] sm:$0xff] }
  0x4c   :  { %207 = vbcast.lane.b32.xlu1 %v205_v2, 256  ;;  %v496_v2 = vmul.f32 -1.442695, %v351_v62 }
  0x4f   :  { %200 = vbcast.lane.b32.xlu0 %v198_v5, 256 }
  0x50   :  { %214 = vbcast.lane.b32.xlu1 %v212_v7, 256 }
  0x53   :  { %228 = vbcast.lane.b32.xlu0 %v226_v10, 256 }
  0x54   :  { %221 = vbcast.lane.b32.xlu1 %v219_v12, 256 }
  0x57   :  { %242 = vbcast.lane.b32.xlu0 %v240_v14, 256 }
  0x58   :  { %235 = vbcast.lane.b32.xlu1 %v233_v15, 256 }
  0x5c   :  { %249 = vbcast.lane.b32.xlu1 %v247_v16, 256 }
  0xb6   :  { %v171_v18 = vpop.xlane.xlu0 %170 }
  0xb8   :  { %v177_v19 = vpop.xlane.xlu1 %176 }
  0xba   :  { %v174_v20 = vpop.xlane.xlu0 %173 }
  0xbc   :  { %v180_v21 = vpop.xlane.xlu1 %179 }
  0xbe   :  { %v183_v22 = vpop.xlane.xlu0 %182 }
  0xc0   :  { %v186_v23 = vpop.xlane.xlu1 %185 }
  0xc2   :  { %v189_v24 = vpop.xlane.xlu0 %188 }
  0xc4   :  { %v192_v25 = vpop.xlane.xlu1 %191 }
  0xc6   :  { %v201_v26 = vpop.permute.xlu0 %200 }
  0xc7   :  { %v259_v27 = vadd.f32 %v201_v26, %v171_v18 }
  0xc8   :  { %v208_v28 = vpop.permute.xlu1 %207 }
  0xc9   :  { %v488_v29 = vmul.f32 -1.442695, %v259_v27  ;;  %v260_v30 = vadd.f32 %v208_v28, %v174_v20 }
  0xca   :  { %v229_v31 = vpop.permute.xlu0 %228 }
  0xcb   :  { %509 = vpow2.f32 %v488_v29  ;;  %v489_v32 = vmul.f32 -1.442695, %v260_v30  ;;  %v263_v33 = vadd.f32 %v229_v31, %v183_v22 }
  0xcc   :  { %v215_v34 = vpop.permute.xlu1 %214 }
  0xcd   :  { %511 = vpow2.f32 %v489_v32  ;;  %v492_v35 = vmul.f32 -1.442695, %v263_v33  ;;  %v261_v36 = vadd.f32 %v215_v34, %v177_v19 }
  0xce   :  { %v243_v37 = vpop.permute.xlu0 %242 }
  0xcf   :  { %513 = vpow2.f32 %v492_v35  ;;  %v490_v38 = vmul.f32 -1.442695, %v261_v36  ;;  %v265_v39 = vadd.f32 %v243_v37, %v189_v24 }
  0xd0   :  { %v222_v40 = vpop.permute.xlu1 %221 }
  0xd1   :  { %515 = vpow2.f32 %v490_v38  ;;  %v494_v41 = vmul.f32 -1.442695, %v265_v39  ;;  %v262_v42 = vadd.f32 %v222_v40, %v180_v21 }
  0xd3   :  { %517 = vpow2.f32 %v494_v41  ;;  %v491_v43 = vmul.f32 -1.442695, %v262_v42 }
  0xd4   :  { %v236_v44 = vpop.permute.xlu1 %235 }
  0xd5   :  { %519 = vpow2.f32 %v491_v43  ;;  %v264_v45 = vadd.f32 %v236_v44, %v186_v23 }
  0xd7   :  { %v493_v46 = vmul.f32 -1.442695, %v264_v45 }
  0xd8   :  { %v510_v47 = vpop.eup %509  ;;  %v250_v48 = vpop.permute.xlu1 %249 }
  0xd9   :  { %v291_v49 = vadd.f32 1.0, %v510_v47  ;;  %521 = vpow2.f32 %v493_v46  ;;  %v266_v50 = vadd.f32 %v250_v48, %v192_v25 }
  0xda   :  { %v512_v51 = vpop.eup %511 }
  0xdb   :  { %523 = vrcp.f32 %v291_v49  ;;  %v292_v52 = vadd.f32 1.0, %v512_v51  ;;  %v495_v53 = vmul.f32 -1.442695, %v266_v50 }
  0xdc   :  { %v514_v54 = vpop.eup %513 }
  0xdd   :  { %525 = vrcp.f32 %v292_v52  ;;  %v295_v55 = vadd.f32 1.0, %v514_v54  ;;  %v410_v54 = vand.u32 127, %v53_v0 }
  0xde   :  { %v516_v56 = vpop.eup %515  ;;  %527 = vpow2.f32 %v495_v53 }
  0xdf   :  { %529 = vrcp.f32 %v295_v55  ;;  %v293_v57 = vadd.f32 1.0, %v516_v56  ;;  %v413_v56 = vsub.s32 %v410_v54, %v659_v3 }
  0xe0   :  { %v518_v58 = vpop.eup %517 }
  0xe1   :  { %531 = vrcp.f32 %v293_v57  ;;  %v297_v59 = vadd.f32 1.0, %v518_v58 }
  0xe2   :  { %v520_v60 = vpop.eup %519 }
  0xe3   :  { %533 = vrcp.f32 %v297_v59  ;;  %v294_v61 = vadd.f32 1.0, %v520_v60 }
  0xe5   :  { %535 = vrcp.f32 %v294_v61 }
  0xe6   :  { %v522_v63 = vpop.eup %521 }
  0xe7   :  { %v296_v1 = vadd.f32 1.0, %v522_v63 }
  0xe8   :  { %v524_v4 = vpop.eup %523 }
  0xe9   :  { %537 = vrcp.f32 %v296_v1  ;;  %v315_v5 = vsub.f32 1.0, %v524_v4 }
  0xea   :  { %v526_v6 = vpop.eup %525  ;;  %539 = vpow2.f32 %v496_v2 }
  0xeb   :  { %v528_v7 = vpop.eup %527  ;;  %v323_v9 = vadd.f32 1e-08, %v315_v5  ;;  %v316_v10 = vsub.f32 1.0, %v526_v6 }
  0xec   :  { %v530_v11 = vpop.eup %529  ;;  %v298_v12 = vadd.f32 1.0, %v528_v7 }
  0xed   :  { %541 = vlog2.f32 %v323_v9  ;;  %v324_v13 = vadd.f32 1e-08, %v316_v10  ;;  %v319_v14 = vsub.f32 1.0, %v530_v11 }
  0xee   :  { %v532_v15 = vpop.eup %531  ;;  %543 = vrcp.f32 %v298_v12 }
  0xef   :  { %545 = vlog2.f32 %v324_v13  ;;  %v317_v8 = vsub.f32 1.0, %v532_v15  ;;  %v327_v18 = vadd.f32 1e-08, %v319_v14 }
  0xf0   :  { %v534_v16 = vpop.eup %533 }
  0xf1   :  { %v325_v17 = vadd.f32 1e-08, %v317_v8  ;;  %v321_v19 = vsub.f32 1.0, %v534_v16 }
  0xf2   :  { %v536_v20 = vpop.eup %535 }
  0xf3   :  { %547 = vlog2.f32 %v325_v17  ;;  %v318_v21 = vsub.f32 1.0, %v536_v20  ;;  %v329_v23 = vadd.f32 1e-08, %v321_v19 }
  0xf4   :  { %549 = vlog2.f32 %v327_v18 }
  0xf5   :  { %v326_v22 = vadd.f32 1e-08, %v318_v21 }
  0xf6   :  { %v538_v24 = vpop.eup %537 }
  0xf7   :  { %551 = vlog2.f32 %v326_v22  ;;  %v320_v25 = vsub.f32 1.0, %v538_v24  ;;  %v540_v26 = vpop.eup %539 }
  0xf8   :  { %553 = vlog2.f32 %v329_v23  ;;  %v355_v31 = vadd.f32 1.0, %v540_v26 }
  0xf9   :  { %v328_v27 = vadd.f32 1e-08, %v320_v25 }
  0xfa   :  { %v542_v28 = vpop.eup %541 }
  0xfb   :  { %v544_v29 = vpop.eup %543  ;;  %v332_v30 = vmul.f32 0.6931472, %v542_v28  ;;  %555 = vlog2.f32 %v328_v27 }
  0xfc   :  { %v546_v32 = vpop.eup %545  ;;  %v322_v33 = vsub.f32 1.0, %v544_v29  ;;  %557 = vrcp.f32 %v355_v31 }
  0xfd   :  { %386 = vperm.xlu0 %506, %v332_v30   ;;  %v334_v34 = vmul.f32 0.6931472, %v546_v32 }
  0xfe   :  { %v330_v35 = vadd.f32 1e-08, %v322_v33 }
  0xff   :  { %389 = vperm.xlu1 %507, %v334_v34  }
 0x100   :  { %v548_v36 = vpop.eup %547  ;;  %559 = vlog2.f32 %v330_v35 }
 0x101   :  { %v336_v37 = vmul.f32 0.6931472, %v548_v36  ;;  %v550_v38 = vpop.eup %549 }
 0x102   :  { %v340_v40 = vmul.f32 0.6931472, %v550_v38 }
 0x103   :  { %392 = vperm.xlu1 %507, %v336_v37  }
 0x104   :  { %v552_v39 = vpop.eup %551 }
 0x105   :  { %v338_v41 = vmul.f32 0.6931472, %v552_v39  ;;  %v554_v42 = vpop.eup %553 }
 0x106   :  { %v344_v44 = vmul.f32 0.6931472, %v554_v42 }
 0x107   :  { %398 = vperm.xlu1 %507, %v340_v40   ;;  %395 = vperm.xlu0 %506, %v338_v41  }
 0x108   :  { %v556_v43 = vpop.eup %555 }
 0x109   :  { %v342_v45 = vmul.f32 0.6931472, %v556_v43  ;;  %v558_v46 = vpop.eup %557 }
 0x10a   :  { %v358_v49 = vsub.f32 1.0, %v558_v46 }
 0x10b   :  { %404 = vperm.xlu1 %507, %v344_v44   ;;  %401 = vperm.xlu0 %506, %v342_v45  }
 0x10c   :  { %v359_v50 = vadd.f32 1e-08, %v358_v49 }
 0x10d   :  { %v560_v47 = vpop.eup %559 }
 0x10e   :  { %v346_v48 = vmul.f32 0.6931472, %v560_v47  ;;  %561 = vlog2.f32 %v359_v50 }
 0x110   :  { %407 = vperm.xlu0 %506, %v346_v48  }
 0x11b   :  { %v562_v51 = vpop.eup %561 }
 0x11c   :  { %v361_v52 = vmul.f32 0.6931472, %v562_v51 }
 0x11e   :  { %v363_v53 = vsel %vm362_vm1, %v361_v52, 0.0 }
 0x12f   :  { %364 = vadd.xlane.f32.xlu1 %v363_v53 }
 0x178   :  { %v387_v57 = vpop.permute.xlu0 %386 }
 0x179   :  { %v414_v61 = vrot.slane %v387_v57, %v413_v56 }
 0x17a   :  { %v390_v55 = vpop.permute.xlu1 %389 }
 0x17b   :  { %v418_v59 = vrot.slane %v390_v55, %v413_v56 }
 0x17d   :  { %v444_v2 = vsel %vm443_vm2, %v418_v59, %v414_v61 }
 0x17e   :  { %v393_v58 = vpop.permute.xlu1 %392 }
 0x17f   :  { %v422_v60 = vrot.slane %v393_v58, %v413_v56 }
 0x181   :  { %v446_v4 = vsel %vm445_vm3, %v422_v60, %v444_v2 }
 0x182   :  { %v396_v62 = vpop.permute.xlu0 %395  ;;  %v399_v63 = vpop.permute.xlu1 %398 }
 0x183   :  { %v426_v1 = vrot.slane %v396_v62, %v413_v56  ;;  %v430_v5 = vrot.slane %v399_v63, %v413_v56 }
 0x185   :  { %v448_v6 = vsel %vm447_vm4, %v426_v1, %v446_v4 }
 0x186   :  { %v402_v0 = vpop.permute.xlu0 %401  ;;  %v405_v7 = vpop.permute.xlu1 %404  ;;  %v450_v9 = vsel %vm449_vm5, %v430_v5, %v448_v6 }
 0x187   :  { %v434_v3 = vrot.slane %v402_v0, %v413_v56  ;;  %v438_v10 = vrot.slane %v405_v7, %v413_v56 }
 0x189   :  { %v452_v11 = vsel %vm451_vm6, %v434_v3, %v450_v9 }
 0x18a   :  { %v454_v14 = vsel %vm453_vm7, %v438_v10, %v452_v11 }
 0x18b   :  { %v408_v12 = vpop.permute.xlu0 %407 }
 0x18c   :  { %v442_v13 = vrot.slane %v408_v12, %v413_v56 }
 0x18e   :  { %v456_v15 = vsel %vm455_vm8, %v442_v13, %v454_v14 }
 0x18f   :  { %v459_v8 = vsel %vm458_vm9, %v456_v15, 0.0 }
 0x190   :  { %460 = vadd.xlane.f32.xlu0 %v459_v8 }
 0x1b8   :  { %v365_v16 = vpop.xlane.xlu1 %364 }
 0x1b9   :  { %v366_v17 = vrot.slane %v365_v16, 4 }
 0x1bb   :  { %v367_v18 = vadd.f32 %v366_v17, %v365_v16 }
 0x1bd   :  { %v368_v19 = vrot.slane %v367_v18, 2 }
 0x1bf   :  { %v369_v20 = vadd.f32 %v368_v19, %v367_v18 }
 0x1c1   :  { %v370_v21 = vrot.slane %v369_v20, 1 }
 0x1c3   :  { %v371_v22 = vadd.f32 %v370_v21, %v369_v20 }
 0x1c5   :  { %497 = vpush %v371_v22 }
 0x1f6   :  { %s498_s4 = spop %497 }
 0x1f7   :  { %s373_s30 = ssub.f32 0.0, %s498_s4 }
 0x219   :  { %v461_v23 = vpop.xlane.xlu0 %460 }
 0x21a   :  { %v462_v24 = vrot.slane %v461_v23, 4 }
 0x21c   :  { %v463_v25 = vadd.f32 %v462_v24, %v461_v23 }
 0x21e   :  { %v464_v26 = vrot.slane %v463_v25, 2 }
 0x220   :  { %v465_v27 = vadd.f32 %v464_v26, %v463_v25 }
 0x222   :  { %v466_v28 = vrot.slane %v465_v27, 1 }
 0x224   :  { %v467_v29 = vadd.f32 %v466_v28, %v465_v27 }
 0x226   :  { %499 = vpush %v467_v29 }
 0x257   :  { %s500_s6 = spop %499 }
 0x258   :  { %s469_s7 = sadd.f32 %s500_s6, %s373_s30 }
 0x25a   :  { %471 = sst [smem:[#allocation7]] %s469_s7 }
 0x25b   :  { %479 = dma.smem_to_hbm %s621_s8, 16, %s708_s5, [#allocation4]  }
 0x25c   :  { %615 = dma.done.wait [#allocation4], 16  }
 0x25d   :  { %616 = vsyncadd [#allocation4], 4294967280 }
 0x25e   :  { %483 = sfence }
 0x25f   :  { %484 = vsyncpa [#allocation3], 1 }
 0x260   :  { %485 = vsyncpa [#allocation6], 1 }
 0x261   :  { %486 = vsyncpa [#allocation4], 1 }

</bundles_post_ra>
